<compile_context>
chip_gen: v5e
topology: v5e:2x2
jax: 0.10.0
libtpu: 0.0.40
codegen_flags: <defaults>
</compile_context>

<pallas_src>
import functools

import jax
import jax.numpy as jnp
from jax.experimental import pallas as pl
from jax.experimental.pallas import tpu as pltpu

LANDMARK_DIM = 8          # param.landmark_size * 2, landmark_size = 4
_BIG_NEG = -1e9           # mining loss for padded priors (never selected)
_FAR = 1e7                # coordinate for padded GT rows (never matched)


def _round_up(x, m):
    return -(-x // m) * m


def _largest_divisor_tile(total, caps):
    for t in caps:
        if t <= total and total % t == 0:
            return t
    return 128


def _pick_rank_tiles(batch, p_pad, budget_bytes=4 << 20):
    """i/j tiles for the O(P^2) rank pass; keeps ~3 live (B,TJ,TI) f32
    temporaries under `budget_bytes` (v7x has only 64 MiB physical VMEM)."""
    ti = _largest_divisor_tile(p_pad, (512, 256, 128))
    tj = _largest_divisor_tile(p_pad, (512, 256, 128))
    while batch * ti * tj * 4 * 3 > budget_bytes and tj > 8:
        tj //= 2
    while batch * ti * tj * 4 * 3 > budget_bytes and ti > 128:
        ti //= 2
    return ti, tj


# -----------------------------------------------------------------------------
# Kernel A: matching + PCA targets + landmark losses + per-prior cross-entropy.
# Everything lane-dense in P; grid = (B, P_pad // TP), both axes parallel.
# -----------------------------------------------------------------------------
def _match_ce_kernel(gt_ref, priors_ref, projT_ref, pred_ref, conf_in_ref,
                     isv_ref, conf_t_ref, ce_ref, sl1_ref, wl_ref,
                     *, thr_sq, p_orig, num_feat):
    p_tile = pl.program_id(1)
    tpa = priors_ref.shape[1]

    gt = gt_ref[0]                                    # (Gp, 8), pixel space
    pr = priors_ref[...]                              # (8, TP), pixel space

    # exact-f32 squared cdist, expanded over the 8 coordinates (VPU only).
    num_gt = gt.shape[0]
    d2 = jnp.zeros((num_gt, tpa), jnp.float32)
    for k in range(LANDMARK_DIM):
        diff = gt[:, k:k + 1] - pr[k:k + 1, :]        # (Gp, TP)
        d2 = d2 + diff * diff

    best = jnp.min(d2, axis=0, keepdims=True)         # (1, TP)
    rowi = jax.lax.broadcasted_iota(jnp.int32, d2.shape, 0)
    first = jnp.min(jnp.where(d2 <= best, rowi, num_gt),
                    axis=0, keepdims=True)            # argmin (first tie)
    one_hot = (rowi == first).astype(jnp.float32)     # (Gp, TP), exact 0/1

    # fused gather: rows 0..F-1 = PCA weights of matched GT, row F = its label.
    projT = projT_ref[0]                              # (F+1, Gp)
    matched = jnp.dot(projT, one_hot,
                      preferred_element_type=jnp.float32)   # (F+1, TP)
    pca_w = matched[:-1, :]                           # (F, TP)
    lab = matched[-1:, :]                             # (1, TP)

    lane = jax.lax.broadcasted_iota(jnp.int32, (1, tpa), 1) + p_tile * tpa
    valid = lane < p_orig                             # mask padded priors
    is_pos = jnp.logical_and(best < thr_sq, valid)    # (1, TP)
    posf = is_pos.astype(jnp.float32)

    # +0.5 then trunc == round-half-up for non-negative integer class labels
    conf_t_ref[0] = jnp.where(is_pos, lab + 0.5, 0.0).astype(jnp.int32)

    # ---- positive-sample landmark losses (per-prior, reduced in XLA) --------
    pred = pred_ref[0]                                # (F, TP), predicted weights
    pca_t = jnp.where(is_pos, pca_w, 0.0)             # encoded target
    dlt = pred - pca_t
    ad = jnp.abs(dlt)
    sl1 = jnp.where(ad < 1.0, 0.5 * dlt * dlt, ad - 0.5)   # smooth_l1, beta=1
    sl1_ref[0] = jnp.sum(sl1, axis=0, keepdims=True) * posf

    pred_abs = jnp.abs(pred) * posf                   # (F, TP)
    wl = jnp.zeros((1, tpa), jnp.float32)
    for f in range(num_feat):                         # sqrt(p*p/sv) == |p|*rsqrt(sv)
        wl = wl + isv_ref[f] * pred_abs[f:f + 1, :]
    wl_ref[0] = wl

    # ---- per-prior cross-entropy (target class 1 for positives, 0 otherwise,
    #      matching torch's `conf_t[pos] = 1` before the gather) --------------
    conf = conf_in_ref[0]                             # (C, TP)
    m = jnp.max(conf, axis=0, keepdims=True)
    lse = jnp.log(jnp.sum(jnp.exp(conf - m), axis=0, keepdims=True)) + m
    conf_at_t = jnp.where(is_pos, conf[1:2, :], conf[0:1, :])
    ce_ref[0] = jnp.where(valid, lse - conf_at_t, 0.0)


# -----------------------------------------------------------------------------
# Kernel B: hard-negative-mining rank -> neg mask.
# Grid over i-tiles (parallel); fori_loop over j-tiles; compare tile (B,TJ,TI).
# -----------------------------------------------------------------------------
def _mining_kernel(ce_ref, conft_ref, nneg_ref, neg_ref, *, ti, tj, p_orig):
    batch, p_pad = ce_ref.shape
    n_j = p_pad // tj
    i0 = pl.multiple_of(pl.program_id(0) * ti, ti)

    idx_i = jax.lax.broadcasted_iota(jnp.int32, (1, ti), 1) + i0     # (1, TI)
    valid_i = idx_i < p_orig
    ce_i = ce_ref[:, pl.ds(i0, ti)]                                  # (B, TI)
    pos_i = conft_ref[:, pl.ds(i0, ti)] > 0
    loss_i = jnp.where(jnp.logical_and(valid_i, jnp.logical_not(pos_i)),
                       ce_i, 0.0)
    loss_i = jnp.where(valid_i, loss_i, _BIG_NEG)
    li = loss_i[:, None, :]                                          # (B, 1, TI)

    def body(jj, rank):
        j0 = pl.multiple_of(jj * tj, tj)
        jlane = jax.lax.broadcasted_iota(jnp.int32, (1, tj), 1) + j0  # (1, TJ)
        valid_j = jlane < p_orig
        ce_j = ce_ref[:, pl.ds(j0, tj)]                               # (B, TJ)
        pos_j = conft_ref[:, pl.ds(j0, tj)] > 0
        loss_j = jnp.where(jnp.logical_and(valid_j, jnp.logical_not(pos_j)),
                           ce_j, 0.0)
        loss_j = jnp.where(valid_j, loss_j, _BIG_NEG)                 # (B, TJ)
        lj = loss_j[:, :, None]                                       # (B, TJ, 1)

        # tie mask built once WITHOUT the batch dim: j_global < i_global
        jg = jax.lax.broadcasted_iota(jnp.int32, (tj, 1), 0) + j0     # (TJ, 1)
        tie = (jg < idx_i)[None, :, :]                                # (1, TJ, TI)

        cmp = jnp.logical_or(lj > li, jnp.logical_and(lj == li, tie))
        return rank + jnp.sum(cmp.astype(jnp.float32), axis=1)        # (B, TI)

    rank = jax.lax.fori_loop(0, n_j, body, jnp.zeros((batch, ti), jnp.float32))

    nneg = nneg_ref[...]                                              # (B, 1)
    neg = jnp.logical_and(rank < nneg, valid_i)                       # (B, TI)
    neg_ref[...] = neg.astype(jnp.int32)


# -----------------------------------------------------------------------------
# Wrapper: parameter prep, padding, pallas_call plumbing, final reductions.
# -----------------------------------------------------------------------------
def retinaface_landmark_pca_loss(predictions, prior_landmarks, targets,
                                 pca_mean, pca_features, singular_values,
                                 *, img_width, img_height,
                                 pos_sample_score_threshold, neg_pos_ratio):
    loc_data, conf_data, landm_pca_weight = predictions
    B, P, C = conf_data.shape
    F_ = landm_pca_weight.shape[-1]
    G = targets.shape[1]
    assert loc_data.shape[1] == prior_landmarks.shape[0]

    f32 = jnp.float32
    scale = jnp.array([img_width, img_height] * 4, f32)               # (8,)

    P_pad = _round_up(P, 128)
    G_pad = _round_up(max(G, 1), 8)

    # --- tiny parameter / target prep stays in XLA ---------------------------
    priors_t = (prior_landmarks.astype(f32) * scale).T                # (8, P)
    if P_pad != P:
        priors_t = jnp.pad(priors_t, ((0, 0), (0, P_pad - P)))
    gt_landm = targets[:, :, 4:4 + LANDMARK_DIM].astype(f32) * scale  # (B, G, 8)
    labels = targets[:, :, -1:].astype(f32)                           # (B, G, 1)
    gt_proj = jnp.einsum('bgd,fd->bgf',
                         gt_landm - pca_mean.astype(f32).reshape(1, 1, LANDMARK_DIM),
                         pca_features.astype(f32))                    # (B, G, F)
    if G_pad != G:
        gt_landm = jnp.pad(gt_landm, ((0, 0), (0, G_pad - G), (0, 0)),
                           constant_values=_FAR)
        gt_proj = jnp.pad(gt_proj, ((0, 0), (0, G_pad - G), (0, 0)))
        labels = jnp.pad(labels, ((0, 0), (0, G_pad - G), (0, 0)))
    projT = jnp.transpose(jnp.concatenate([gt_proj, labels], axis=-1),
                          (0, 2, 1))                                  # (B, F+1, Gp)
    inv_sqrt_sv = jax.lax.rsqrt(singular_values.astype(f32)).reshape(F_)
    thr_sq = float(pos_sample_score_threshold) ** 2

    pred_t = jnp.transpose(landm_pca_weight.astype(f32), (0, 2, 1))   # (B, F, P)
    conf_bcp = jnp.transpose(conf_data.astype(f32), (0, 2, 1))        # (B, C, P)
    if P_pad != P:
        pred_t = jnp.pad(pred_t, ((0, 0), (0, 0), (0, P_pad - P)))
        conf_bcp = jnp.pad(conf_bcp, ((0, 0), (0, 0), (0, P_pad - P)))

    # --- kernel A: matching + targets + landmark losses + CE -----------------
    TPa = _largest_divisor_tile(P_pad, (2048, 1024, 512, 256, 128))
    nP = P_pad // TPa

    conf_t, ce, sl1_pp, wl_pp = pl.pallas_call(
        functools.partial(_match_ce_kernel, thr_sq=thr_sq, p_orig=P,
                          num_feat=F_),
        grid=(B, nP),
        in_specs=[
            pl.BlockSpec((1, G_pad, LANDMARK_DIM), lambda b, p: (b, 0, 0)),
            pl.BlockSpec((LANDMARK_DIM, TPa), lambda b, p: (0, p)),
            pl.BlockSpec((1, F_ + 1, G_pad), lambda b, p: (b, 0, 0)),
            pl.BlockSpec((1, F_, TPa), lambda b, p: (b, 0, p)),
            pl.BlockSpec((1, C, TPa), lambda b, p: (b, 0, p)),
            pl.BlockSpec(memory_space=pltpu.MemorySpace.SMEM),
        ],
        out_specs=(
            pl.BlockSpec((1, 1, TPa), lambda b, p: (b, 0, p)),
            pl.BlockSpec((1, 1, TPa), lambda b, p: (b, 0, p)),
            pl.BlockSpec((1, 1, TPa), lambda b, p: (b, 0, p)),
            pl.BlockSpec((1, 1, TPa), lambda b, p: (b, 0, p)),
        ),
        out_shape=(
            jax.ShapeDtypeStruct((B, 1, P_pad), jnp.int32),
            jax.ShapeDtypeStruct((B, 1, P_pad), f32),
            jax.ShapeDtypeStruct((B, 1, P_pad), f32),
            jax.ShapeDtypeStruct((B, 1, P_pad), f32),
        ),
        compiler_params=pltpu.CompilerParams(
            dimension_semantics=("parallel", "parallel")),
    )(gt_landm, priors_t, projT, pred_t, conf_bcp, inv_sqrt_sv)

    conf_t2d = conf_t[:, 0, :]                                        # (B, P_pad)
    ce2d = ce[:, 0, :]
    pos_mask = conf_t2d > 0
    num_pos_b = jnp.sum(pos_mask, axis=1, keepdims=True).astype(f32)  # (B, 1)
    num_neg_b = jnp.minimum(float(neg_pos_ratio) * num_pos_b, float(P - 1))

    # --- kernel B: hard-negative mining (O(P^2) rank, bounded tiles) ---------
    TI, TJ = _pick_rank_tiles(B, P_pad)
    nI = P_pad // TI
    vmem_need = (2 * 2 * B * P_pad * 4 + 2 * B * TI * 4
                 + 3 * B * TI * TJ * 4)
    vmem_limit = int(min(max(vmem_need * 3, 32 << 20), 48 << 20))

    neg_mask = pl.pallas_call(
        functools.partial(_mining_kernel, ti=TI, tj=TJ, p_orig=P),
        grid=(nI,),
        in_specs=[
            pl.BlockSpec((B, P_pad), lambda i: (0, 0)),
            pl.BlockSpec((B, P_pad), lambda i: (0, 0)),
            pl.BlockSpec((B, 1), lambda i: (0, 0)),
        ],
        out_specs=pl.BlockSpec((B, TI), lambda i: (0, i)),
        out_shape=jax.ShapeDtypeStruct((B, P_pad), jnp.int32),
        compiler_params=pltpu.CompilerParams(
            dimension_semantics=("parallel",),
            vmem_limit_bytes=vmem_limit),
    )(ce2d, conf_t2d, num_neg_b)

    # --- final reductions / normalisations (tiny, stays in XLA) --------------
    num_pos_total = jnp.sum(num_pos_b)
    N = jnp.maximum(num_pos_total, 1.0)                # N == N1 (pos1 == pos)
    loss_landm = jnp.sum(sl1_pp) / N
    loss_weight = jnp.sum(wl_pp) / N
    selected = jnp.logical_or(pos_mask, neg_mask > 0)
    loss_c = jnp.sum(jnp.where(selected, ce2d, 0.0)) / N
    focal_loss = 0.0

    # TODO(synk): torch .nonzero() yields dynamic-shape index tensors; here they
    #             are fixed-size index arrays padded with -1.
    pos_valid = pos_mask[:, :P].astype(jnp.int32)
    neg_valid = (neg_mask[:, :P] > 0).astype(jnp.int32)
    nonzero_b = jax.vmap(lambda m: jnp.nonzero(m, size=P, fill_value=-1)[0])
    pos_all = nonzero_b(pos_valid)
    neg_all = nonzero_b(neg_valid)
    pos_sample_index = [pos_all[b] for b in range(B)]
    neg_sample_index = [neg_all[b] for b in range(B)]

    return (focal_loss, loss_c, loss_landm, loss_weight,
            pos_sample_index, neg_sample_index)


if __name__ == "__main__":
    B, P, G, C, F_ = 2, 128, 8, 2, 4
    IMG_W = IMG_H = 64.0
    POS_THR = 65.0        # positive_sample_score_threshold (pixel distance)
    NEG_POS_RATIO = 3

    key = jax.random.PRNGKey(0)
    k = jax.random.split(key, 8)
    loc_data = jax.random.normal(k[0], (B, P, 4), jnp.float32)
    conf_data = jax.random.normal(k[1], (B, P, C), jnp.float32)
    landm_pca_weight = jax.random.normal(k[2], (B, P, F_), jnp.float32)
    prior_landmarks = jax.random.uniform(k[3], (P, LANDMARK_DIM), jnp.float32)
    gt_boxes = jax.random.uniform(k[4], (B, G, 4), jnp.float32)
    gt_landms = jax.random.uniform(k[5], (B, G, LANDMARK_DIM), jnp.float32)
    labels = jnp.ones((B, G, 1), jnp.float32)                 # face class = 1
    targets = jnp.concatenate([gt_boxes, gt_landms, labels], axis=-1)  # (B,G,13)

    # deterministic synthetic PCA parameters (pca_param_dict)
    pca_mean = jax.random.normal(k[6], (LANDMARK_DIM,), jnp.float32)
    pca_features = jax.random.normal(k[7], (F_, LANDMARK_DIM), jnp.float32)
    singular_values = jnp.linspace(1.0, 4.0, F_, dtype=jnp.float32)

    out = retinaface_landmark_pca_loss(
        (loc_data, conf_data, landm_pca_weight),
        prior_landmarks, targets,
        pca_mean, pca_features, singular_values,
        img_width=IMG_W, img_height=IMG_H,
        pos_sample_score_threshold=POS_THR, neg_pos_ratio=NEG_POS_RATIO)

    focal_loss, loss_c, loss_landm, loss_weight, pos_idx, neg_idx = out
    jax.block_until_ready((loss_c, loss_landm, loss_weight, pos_idx, neg_idx))
    print("KERNEL_OK")
</pallas_src>

<mosaic_0001>
module attributes {stable_mosaic.version = 11 : i64} {
  func.func @_match_ce_kernel(%arg0: i32, %arg1: i32, %arg2: memref<1x8x8xf32, #tpu.memory_space<vmem>>, %arg3: memref<8x128xf32, #tpu.memory_space<vmem>>, %arg4: memref<1x5x8xf32, #tpu.memory_space<vmem>>, %arg5: memref<1x4x128xf32, #tpu.memory_space<vmem>>, %arg6: memref<1x2x128xf32, #tpu.memory_space<vmem>>, %arg7: memref<4xf32, #tpu.memory_space<smem>>, %arg8: memref<1x1x128xi32, #tpu.memory_space<vmem>>, %arg9: memref<1x1x128xf32, #tpu.memory_space<vmem>>, %arg10: memref<1x1x128xf32, #tpu.memory_space<vmem>>, %arg11: memref<1x1x128xf32, #tpu.memory_space<vmem>>) attributes {dimension_semantics = [#tpu.dimension_semantics<parallel>, #tpu.dimension_semantics<parallel>], iteration_bounds = array<i64: 2, 1>, scalar_prefetch = 0 : i64, scratch_operands = 0 : i64, tpu.core_type = #tpu.core_type<tc>, window_params = [{transform_indices = @transform_0, window_bounds = array<i64: 1, 8, 8>}, {transform_indices = @transform_1, window_bounds = array<i64: 8, 128>}, {transform_indices = @transform_2, window_bounds = array<i64: 1, 5, 8>}, {transform_indices = @transform_3, window_bounds = array<i64: 1, 4, 128>}, {transform_indices = @transform_4, window_bounds = array<i64: 1, 2, 128>}, {transform_indices = @transform_5, window_bounds = array<i64: 4>}, {transform_indices = @transform_6, window_bounds = array<i64: 1, 1, 128>}, {transform_indices = @transform_7, window_bounds = array<i64: 1, 1, 128>}, {transform_indices = @transform_8, window_bounds = array<i64: 1, 1, 128>}, {transform_indices = @transform_9, window_bounds = array<i64: 1, 1, 128>}]} {
    %c0 = arith.constant 0 : index
    %c0_0 = arith.constant 0 : index
    %c0_1 = arith.constant 0 : index
    %0 = vector.load %arg2[%c0, %c0_0, %c0_1] : memref<1x8x8xf32, #tpu.memory_space<vmem>>, vector<1x8x8xf32>
    %1 = vector.shape_cast %0 : vector<1x8x8xf32> to vector<8x8xf32>
    %c0_2 = arith.constant 0 : index
    %c0_3 = arith.constant 0 : index
    %2 = vector.load %arg3[%c0_2, %c0_3] : memref<8x128xf32, #tpu.memory_space<vmem>>, vector<8x128xf32>
    %cst = arith.constant 0.000000e+00 : f32
    %3 = vector.broadcast %cst : f32 to vector<8x128xf32>
    %4 = vector.extract_strided_slice %1 {offsets = [0, 0], sizes = [8, 1], strides = [1, 1]} : vector<8x8xf32> to vector<8x1xf32>
    %5 = vector.extract_strided_slice %2 {offsets = [0, 0], sizes = [1, 128], strides = [1, 1]} : vector<8x128xf32> to vector<1x128xf32>
    %6 = vector.broadcast %4 : vector<8x1xf32> to vector<8x128xf32>
    %7 = vector.broadcast %5 : vector<1x128xf32> to vector<8x128xf32>
    %8 = arith.subf %6, %7 : vector<8x128xf32>
    %9 = arith.mulf %8, %8 : vector<8x128xf32>
    %10 = arith.addf %3, %9 : vector<8x128xf32>
    %11 = vector.extract_strided_slice %1 {offsets = [0, 1], sizes = [8, 1], strides = [1, 1]} : vector<8x8xf32> to vector<8x1xf32>
    %12 = vector.extract_strided_slice %2 {offsets = [1, 0], sizes = [1, 128], strides = [1, 1]} : vector<8x128xf32> to vector<1x128xf32>
    %13 = vector.broadcast %11 : vector<8x1xf32> to vector<8x128xf32>
    %14 = vector.broadcast %12 : vector<1x128xf32> to vector<8x128xf32>
    %15 = arith.subf %13, %14 : vector<8x128xf32>
    %16 = arith.mulf %15, %15 : vector<8x128xf32>
    %17 = arith.addf %10, %16 : vector<8x128xf32>
    %18 = vector.extract_strided_slice %1 {offsets = [0, 2], sizes = [8, 1], strides = [1, 1]} : vector<8x8xf32> to vector<8x1xf32>
    %19 = vector.extract_strided_slice %2 {offsets = [2, 0], sizes = [1, 128], strides = [1, 1]} : vector<8x128xf32> to vector<1x128xf32>
    %20 = vector.broadcast %18 : vector<8x1xf32> to vector<8x128xf32>
    %21 = vector.broadcast %19 : vector<1x128xf32> to vector<8x128xf32>
    %22 = arith.subf %20, %21 : vector<8x128xf32>
    %23 = arith.mulf %22, %22 : vector<8x128xf32>
    %24 = arith.addf %17, %23 : vector<8x128xf32>
    %25 = vector.extract_strided_slice %1 {offsets = [0, 3], sizes = [8, 1], strides = [1, 1]} : vector<8x8xf32> to vector<8x1xf32>
    %26 = vector.extract_strided_slice %2 {offsets = [3, 0], sizes = [1, 128], strides = [1, 1]} : vector<8x128xf32> to vector<1x128xf32>
    %27 = vector.broadcast %25 : vector<8x1xf32> to vector<8x128xf32>
    %28 = vector.broadcast %26 : vector<1x128xf32> to vector<8x128xf32>
    %29 = arith.subf %27, %28 : vector<8x128xf32>
    %30 = arith.mulf %29, %29 : vector<8x128xf32>
    %31 = arith.addf %24, %30 : vector<8x128xf32>
    %32 = vector.extract_strided_slice %1 {offsets = [0, 4], sizes = [8, 1], strides = [1, 1]} : vector<8x8xf32> to vector<8x1xf32>
    %33 = vector.extract_strided_slice %2 {offsets = [4, 0], sizes = [1, 128], strides = [1, 1]} : vector<8x128xf32> to vector<1x128xf32>
    %34 = vector.broadcast %32 : vector<8x1xf32> to vector<8x128xf32>
    %35 = vector.broadcast %33 : vector<1x128xf32> to vector<8x128xf32>
    %36 = arith.subf %34, %35 : vector<8x128xf32>
    %37 = arith.mulf %36, %36 : vector<8x128xf32>
    %38 = arith.addf %31, %37 : vector<8x128xf32>
    %39 = vector.extract_strided_slice %1 {offsets = [0, 5], sizes = [8, 1], strides = [1, 1]} : vector<8x8xf32> to vector<8x1xf32>
    %40 = vector.extract_strided_slice %2 {offsets = [5, 0], sizes = [1, 128], strides = [1, 1]} : vector<8x128xf32> to vector<1x128xf32>
    %41 = vector.broadcast %39 : vector<8x1xf32> to vector<8x128xf32>
    %42 = vector.broadcast %40 : vector<1x128xf32> to vector<8x128xf32>
    %43 = arith.subf %41, %42 : vector<8x128xf32>
    %44 = arith.mulf %43, %43 : vector<8x128xf32>
    %45 = arith.addf %38, %44 : vector<8x128xf32>
    %46 = vector.extract_strided_slice %1 {offsets = [0, 6], sizes = [8, 1], strides = [1, 1]} : vector<8x8xf32> to vector<8x1xf32>
    %47 = vector.extract_strided_slice %2 {offsets = [6, 0], sizes = [1, 128], strides = [1, 1]} : vector<8x128xf32> to vector<1x128xf32>
    %48 = vector.broadcast %46 : vector<8x1xf32> to vector<8x128xf32>
    %49 = vector.broadcast %47 : vector<1x128xf32> to vector<8x128xf32>
    %50 = arith.subf %48, %49 : vector<8x128xf32>
    %51 = arith.mulf %50, %50 : vector<8x128xf32>
    %52 = arith.addf %45, %51 : vector<8x128xf32>
    %53 = vector.extract_strided_slice %1 {offsets = [0, 7], sizes = [8, 1], strides = [1, 1]} : vector<8x8xf32> to vector<8x1xf32>
    %54 = vector.extract_strided_slice %2 {offsets = [7, 0], sizes = [1, 128], strides = [1, 1]} : vector<8x128xf32> to vector<1x128xf32>
    %55 = vector.broadcast %53 : vector<8x1xf32> to vector<8x128xf32>
    %56 = vector.broadcast %54 : vector<1x128xf32> to vector<8x128xf32>
    %57 = arith.subf %55, %56 : vector<8x128xf32>
    %58 = arith.mulf %57, %57 : vector<8x128xf32>
    %59 = arith.addf %52, %58 : vector<8x128xf32>
    %cst_4 = arith.constant dense<0x7F800000> : vector<128xf32>
    %60 = vector.multi_reduction <minimumf>, %59, %cst_4 [0] : vector<8x128xf32> to vector<128xf32>
    %61 = vector.shape_cast %60 : vector<128xf32> to vector<1x128xf32>
    %62 = tpu.iota {dimensions = array<i32: 0>} : vector<8x128xi32>
    %63 = vector.broadcast %61 : vector<1x128xf32> to vector<8x128xf32>
    %64 = arith.cmpf ole, %59, %63 : vector<8x128xf32>
    %c8_i32 = arith.constant 8 : i32
    %65 = vector.broadcast %c8_i32 : i32 to vector<8x128xi32>
    %66 = arith.select %64, %62, %65 : vector<8x128xi1>, vector<8x128xi32>
    %cst_5 = arith.constant dense<2147483647> : vector<128xi32>
    %67 = vector.multi_reduction <minsi>, %66, %cst_5 [0] : vector<8x128xi32> to vector<128xi32>
    %68 = vector.shape_cast %67 : vector<128xi32> to vector<1x128xi32>
    %69 = vector.broadcast %68 : vector<1x128xi32> to vector<8x128xi32>
    %70 = arith.cmpi eq, %62, %69 : vector<8x128xi32>
    %71 = arith.extui %70 : vector<8x128xi1> to vector<8x128xi32>
    %72 = arith.sitofp %71 : vector<8x128xi32> to vector<8x128xf32>
    %c0_6 = arith.constant 0 : index
    %c0_7 = arith.constant 0 : index
    %c0_8 = arith.constant 0 : index
    %73 = vector.load %arg4[%c0_6, %c0_7, %c0_8] : memref<1x5x8xf32, #tpu.memory_space<vmem>>, vector<1x5x8xf32>
    %74 = vector.shape_cast %73 : vector<1x5x8xf32> to vector<5x8xf32>
    %cst_9 = arith.constant dense<0.000000e+00> : vector<5x128xf32>
    %75 = tpu.matmul %74, %72, %cst_9 {dimension_numbers = #tpu.dot_dimension_numbers<[1], [0], [0], [1], [0, 0, 1, 1], [], []>} : vector<5x8xf32>, vector<8x128xf32>, vector<5x128xf32> -> vector<5x128xf32>
    %76 = vector.extract_strided_slice %75 {offsets = [0, 0], sizes = [4, 128], strides = [1, 1]} : vector<5x128xf32> to vector<4x128xf32>
    %77 = vector.extract_strided_slice %75 {offsets = [4, 0], sizes = [1, 128], strides = [1, 1]} : vector<5x128xf32> to vector<1x128xf32>
    %78 = tpu.iota {dimensions = array<i32: 1>} : vector<1x128xi32>
    %c128_i32 = arith.constant 128 : i32
    %79 = arith.muli %arg1, %c128_i32 : i32
    %80 = vector.broadcast %79 : i32 to vector<1x128xi32>
    %81 = arith.addi %78, %80 : vector<1x128xi32>
    %c128_i32_10 = arith.constant 128 : i32
    %82 = vector.broadcast %c128_i32_10 : i32 to vector<1x128xi32>
    %83 = arith.cmpi slt, %81, %82 : vector<1x128xi32>
    %cst_11 = arith.constant 4.225000e+03 : f32
    %84 = vector.broadcast %cst_11 : f32 to vector<1x128xf32>
    %85 = arith.cmpf olt, %61, %84 : vector<1x128xf32>
    %86 = arith.andi %85, %83 : vector<1x128xi1>
    %87 = arith.extui %86 : vector<1x128xi1> to vector<1x128xi32>
    %88 = arith.sitofp %87 : vector<1x128xi32> to vector<1x128xf32>
    %cst_12 = arith.constant 5.000000e-01 : f32
    %89 = vector.broadcast %cst_12 : f32 to vector<1x128xf32>
    %90 = arith.addf %77, %89 : vector<1x128xf32>
    %cst_13 = arith.constant 0.000000e+00 : f32
    %91 = vector.broadcast %cst_13 : f32 to vector<1x128xf32>
    %92 = arith.select %86, %90, %91 : vector<1x128xi1>, vector<1x128xf32>
    %93 = arith.fptosi %92 : vector<1x128xf32> to vector<1x128xi32>
    %c0_14 = arith.constant 0 : index
    %c0_15 = arith.constant 0 : index
    %c0_16 = arith.constant 0 : index
    %94 = vector.load %arg8[%c0_14, %c0_15, %c0_16] : memref<1x1x128xi32, #tpu.memory_space<vmem>>, vector<1x1x128xi32>
    %95 = vector.shape_cast %94 : vector<1x1x128xi32> to vector<1x128xi32>
    %96 = vector.shape_cast %93 : vector<1x128xi32> to vector<1x1x128xi32>
    tpu.vector_store %arg8[%c0_14, %c0_15, %c0_16], %96 {strides = array<i32>} : memref<1x1x128xi32, #tpu.memory_space<vmem>>, vector<1x1x128xi32>,
    %c0_17 = arith.constant 0 : index
    %c0_18 = arith.constant 0 : index
    %c0_19 = arith.constant 0 : index
    %97 = vector.load %arg5[%c0_17, %c0_18, %c0_19] : memref<1x4x128xf32, #tpu.memory_space<vmem>>, vector<1x4x128xf32>
    %98 = vector.shape_cast %97 : vector<1x4x128xf32> to vector<4x128xf32>
    %cst_20 = arith.constant 0.000000e+00 : f32
    %99 = vector.shape_cast %86 : vector<1x128xi1> to vector<1x128xi1>
    %100 = vector.broadcast %99 : vector<1x128xi1> to vector<4x128xi1>
    %101 = vector.broadcast %cst_20 : f32 to vector<4x128xf32>
    %102 = arith.select %100, %76, %101 : vector<4x128xi1>, vector<4x128xf32>
    %103 = arith.subf %98, %102 : vector<4x128xf32>
    %104 = math.absf %103 : vector<4x128xf32>
    %cst_21 = arith.constant 1.000000e+00 : f32
    %105 = vector.broadcast %cst_21 : f32 to vector<4x128xf32>
    %106 = arith.cmpf olt, %104, %105 : vector<4x128xf32>
    %cst_22 = arith.constant 5.000000e-01 : f32
    %107 = vector.broadcast %cst_22 : f32 to vector<4x128xf32>
    %108 = arith.mulf %107, %103 : vector<4x128xf32>
    %109 = arith.mulf %108, %103 : vector<4x128xf32>
    %cst_23 = arith.constant 5.000000e-01 : f32
    %110 = vector.broadcast %cst_23 : f32 to vector<4x128xf32>
    %111 = arith.subf %104, %110 : vector<4x128xf32>
    %112 = arith.select %106, %109, %111 : vector<4x128xi1>, vector<4x128xf32>
    %cst_24 = arith.constant dense<0.000000e+00> : vector<128xf32>
    %113 = vector.multi_reduction <add>, %112, %cst_24 [0] : vector<4x128xf32> to vector<128xf32>
    %114 = vector.shape_cast %113 : vector<128xf32> to vector<1x128xf32>
    %115 = arith.mulf %114, %88 : vector<1x128xf32>
    %c0_25 = arith.constant 0 : index
    %c0_26 = arith.constant 0 : index
    %c0_27 = arith.constant 0 : index
    %116 = vector.load %arg10[%c0_25, %c0_26, %c0_27] : memref<1x1x128xf32, #tpu.memory_space<vmem>>, vector<1x1x128xf32>
    %117 = vector.shape_cast %116 : vector<1x1x128xf32> to vector<1x128xf32>
    %118 = vector.shape_cast %115 : vector<1x128xf32> to vector<1x1x128xf32>
    tpu.vector_store %arg10[%c0_25, %c0_26, %c0_27], %118 {strides = array<i32>} : memref<1x1x128xf32, #tpu.memory_space<vmem>>, vector<1x1x128xf32>,
    %119 = math.absf %98 : vector<4x128xf32>
    %120 = vector.broadcast %88 : vector<1x128xf32> to vector<4x128xf32>
    %121 = arith.mulf %119, %120 : vector<4x128xf32>
    %cst_28 = arith.constant 0.000000e+00 : f32
    %122 = vector.broadcast %cst_28 : f32 to vector<1x128xf32>
    %c0_29 = arith.constant 0 : index
    %123 = memref.load %arg7[%c0_29] : memref<4xf32, #tpu.memory_space<smem>>
    %124 = vector.extract_strided_slice %121 {offsets = [0, 0], sizes = [1, 128], strides = [1, 1]} : vector<4x128xf32> to vector<1x128xf32>
    %125 = vector.broadcast %123 : f32 to vector<1x128xf32>
    %126 = arith.mulf %125, %124 : vector<1x128xf32>
    %127 = arith.addf %122, %126 : vector<1x128xf32>
    %c1 = arith.constant 1 : index
    %128 = memref.load %arg7[%c1] : memref<4xf32, #tpu.memory_space<smem>>
    %129 = vector.extract_strided_slice %121 {offsets = [1, 0], sizes = [1, 128], strides = [1, 1]} : vector<4x128xf32> to vector<1x128xf32>
    %130 = vector.broadcast %128 : f32 to vector<1x128xf32>
    %131 = arith.mulf %130, %129 : vector<1x128xf32>
    %132 = arith.addf %127, %131 : vector<1x128xf32>
    %c2 = arith.constant 2 : index
    %133 = memref.load %arg7[%c2] : memref<4xf32, #tpu.memory_space<smem>>
    %134 = vector.extract_strided_slice %121 {offsets = [2, 0], sizes = [1, 128], strides = [1, 1]} : vector<4x128xf32> to vector<1x128xf32>
    %135 = vector.broadcast %133 : f32 to vector<1x128xf32>
    %136 = arith.mulf %135, %134 : vector<1x128xf32>
    %137 = arith.addf %132, %136 : vector<1x128xf32>
    %c3 = arith.constant 3 : index
    %138 = memref.load %arg7[%c3] : memref<4xf32, #tpu.memory_space<smem>>
    %139 = vector.extract_strided_slice %121 {offsets = [3, 0], sizes = [1, 128], strides = [1, 1]} : vector<4x128xf32> to vector<1x128xf32>
    %140 = vector.broadcast %138 : f32 to vector<1x128xf32>
    %141 = arith.mulf %140, %139 : vector<1x128xf32>
    %142 = arith.addf %137, %141 : vector<1x128xf32>
    %c0_30 = arith.constant 0 : index
    %c0_31 = arith.constant 0 : index
    %c0_32 = arith.constant 0 : index
    %143 = vector.load %arg11[%c0_30, %c0_31, %c0_32] : memref<1x1x128xf32, #tpu.memory_space<vmem>>, vector<1x1x128xf32>
    %144 = vector.shape_cast %143 : vector<1x1x128xf32> to vector<1x128xf32>
    %145 = vector.shape_cast %142 : vector<1x128xf32> to vector<1x1x128xf32>
    tpu.vector_store %arg11[%c0_30, %c0_31, %c0_32], %145 {strides = array<i32>} : memref<1x1x128xf32, #tpu.memory_space<vmem>>, vector<1x1x128xf32>,
    %c0_33 = arith.constant 0 : index
    %c0_34 = arith.constant 0 : index
    %c0_35 = arith.constant 0 : index
    %146 = vector.load %arg6[%c0_33, %c0_34, %c0_35] : memref<1x2x128xf32, #tpu.memory_space<vmem>>, vector<1x2x128xf32>
    %147 = vector.shape_cast %146 : vector<1x2x128xf32> to vector<2x128xf32>
    %cst_36 = arith.constant dense<0xFF800000> : vector<128xf32>
    %148 = vector.multi_reduction <maximumf>, %147, %cst_36 [0] : vector<2x128xf32> to vector<128xf32>
    %149 = vector.shape_cast %148 : vector<128xf32> to vector<1x128xf32>
    %150 = vector.broadcast %149 : vector<1x128xf32> to vector<2x128xf32>
    %151 = arith.subf %147, %150 : vector<2x128xf32>
    %152 = math.exp %151 : vector<2x128xf32>
    %cst_37 = arith.constant dense<0.000000e+00> : vector<128xf32>
    %153 = vector.multi_reduction <add>, %152, %cst_37 [0] : vector<2x128xf32> to vector<128xf32>
    %154 = vector.shape_cast %153 : vector<128xf32> to vector<1x128xf32>
    %155 = math.log %154 : vector<1x128xf32>
    %156 = arith.addf %155, %149 : vector<1x128xf32>
    %157 = vector.extract_strided_slice %147 {offsets = [1, 0], sizes = [1, 128], strides = [1, 1]} : vector<2x128xf32> to vector<1x128xf32>
    %158 = vector.extract_strided_slice %147 {offsets = [0, 0], sizes = [1, 128], strides = [1, 1]} : vector<2x128xf32> to vector<1x128xf32>
    %159 = arith.select %86, %157, %158 : vector<1x128xi1>, vector<1x128xf32>
    %160 = arith.subf %156, %159 : vector<1x128xf32>
    %cst_38 = arith.constant 0.000000e+00 : f32
    %161 = vector.broadcast %cst_38 : f32 to vector<1x128xf32>
    %162 = arith.select %83, %160, %161 : vector<1x128xi1>, vector<1x128xf32>
    %c0_39 = arith.constant 0 : index
    %c0_40 = arith.constant 0 : index
    %c0_41 = arith.constant 0 : index
    %163 = vector.load %arg9[%c0_39, %c0_40, %c0_41] : memref<1x1x128xf32, #tpu.memory_space<vmem>>, vector<1x1x128xf32>
    %164 = vector.shape_cast %163 : vector<1x1x128xf32> to vector<1x128xf32>
    %165 = vector.shape_cast %162 : vector<1x128xf32> to vector<1x1x128xf32>
    tpu.vector_store %arg9[%c0_39, %c0_40, %c0_41], %165 {strides = array<i32>} : memref<1x1x128xf32, #tpu.memory_space<vmem>>, vector<1x1x128xf32>,
    return
  }
  func.func @transform_0(%arg0: i32, %arg1: i32) -> (i32, i32, i32) {
    %c0_i32 = arith.constant 0 : i32
    %c0_i32_0 = arith.constant 0 : i32
    %c0_i32_1 = arith.constant 0 : i32
    return %arg0, %c0_i32, %c0_i32_0 : i32, i32, i32
  }
  func.func @transform_1(%arg0: i32, %arg1: i32) -> (i32, i32) {
    %c0_i32 = arith.constant 0 : i32
    %c0_i32_0 = arith.constant 0 : i32
    return %c0_i32, %arg1 : i32, i32
  }
  func.func @transform_2(%arg0: i32, %arg1: i32) -> (i32, i32, i32) {
    %c0_i32 = arith.constant 0 : i32
    %c0_i32_0 = arith.constant 0 : i32
    %c0_i32_1 = arith.constant 0 : i32
    return %arg0, %c0_i32, %c0_i32_0 : i32, i32, i32
  }
  func.func @transform_3(%arg0: i32, %arg1: i32) -> (i32, i32, i32) {
    %c0_i32 = arith.constant 0 : i32
    %c0_i32_0 = arith.constant 0 : i32
    return %arg0, %c0_i32, %arg1 : i32, i32, i32
  }
  func.func @transform_4(%arg0: i32, %arg1: i32) -> (i32, i32, i32) {
    %c0_i32 = arith.constant 0 : i32
    %c0_i32_0 = arith.constant 0 : i32
    return %arg0, %c0_i32, %arg1 : i32, i32, i32
  }
  func.func @transform_5(%arg0: i32, %arg1: i32) -> i32 {
    %c0_i32 = arith.constant 0 : i32
    %c0_i32_0 = arith.constant 0 : i32
    return %c0_i32 : i32
  }
  func.func @transform_6(%arg0: i32, %arg1: i32) -> (i32, i32, i32) {
    %c0_i32 = arith.constant 0 : i32
    %c0_i32_0 = arith.constant 0 : i32
    return %arg0, %c0_i32, %arg1 : i32, i32, i32
  }
  func.func @transform_7(%arg0: i32, %arg1: i32) -> (i32, i32, i32) {
    %c0_i32 = arith.constant 0 : i32
    %c0_i32_0 = arith.constant 0 : i32
    return %arg0, %c0_i32, %arg1 : i32, i32, i32
  }
  func.func @transform_8(%arg0: i32, %arg1: i32) -> (i32, i32, i32) {
    %c0_i32 = arith.constant 0 : i32
    %c0_i32_0 = arith.constant 0 : i32
    return %arg0, %c0_i32, %arg1 : i32, i32, i32
  }
  func.func @transform_9(%arg0: i32, %arg1: i32) -> (i32, i32, i32) {
    %c0_i32 = arith.constant 0 : i32
    %c0_i32_0 = arith.constant 0 : i32
    return %arg0, %c0_i32, %arg1 : i32, i32, i32
  }
}

</mosaic_0001>

<bundles_post_ra>
// kernel: tpu_custom_call.1
= control target key start
LH: loop header
LB: loop body
LE: loop exit
PB: predicated region body
PF: predicated region fallthrough
CT: control target
= control target key end

     0   :  { %s1677_s0 = inlined_call_operand.vmem [shape: f32[2,8,8], index: 0, kind: input, shape index: {}]   ;;  %s1678_s1 = inlined_call_operand.vmem [shape: f32[8,128], index: 1, kind: input, shape index: {}]   ;;  %s1679_s2 = inlined_call_operand.vmem [shape: f32[2,5,8], index: 2, kind: input, shape index: {}]   ;;  %s1680_s3 = inlined_call_operand.hbm [shape: f32[2,4,128], index: 3, kind: input, shape index: {}]   ;;  %s1681_s4 = inlined_call_operand.vmem [shape: f32[2,2,128], index: 4, kind: input, shape index: {}]   ;;  %s1682_s5 = inlined_call_operand.vmem [shape: f32[4], index: 5, kind: input, shape index: {}]   ;;  %s1683_s6 = inlined_call_operand.hbm [shape: s32[2,1,128], index: 6, kind: output, shape index: {0}]   ;;  %s1684_s7 = inlined_call_operand.hbm [shape: f32[2,1,128], index: 7, kind: output, shape index: {1}]   ;;  %s1685_s8 = inlined_call_operand.hbm [shape: f32[2,1,128], index: 8, kind: output, shape index: {2}]   ;;  %s1686_s9 = inlined_call_operand.hbm [shape: f32[2,1,128], index: 9, kind: output, shape index: {3}]  }
   0x1   :  { %1690 = sst [smem:[#allocation20_spill]] %s1677_s0 }
   0x2   :  { %1691 = sst [smem:[#allocation21_spill]] %s1678_s1 }
   0x3   :  { %1692 = sst [smem:[#allocation22_spill]] %s1682_s5 }
   0x4   :  { %15 = vsyncpa [#allocation3], 0 }
   0x5   :  { %17 = vsyncpa [#allocation3 + $0x1], 0 }
   0x6   :  { %18 = vsyncpa [#allocation5], 0 }
   0x7   :  { %19 = vsyncpa [#allocation4], 0 }
   0x8   :  { %21 = vsyncpa [#allocation4 + $0x1], 0 }
   0x9   :  { %22 = vsyncpa [#allocation9], 0 }
   0xa   :  { %24 = vsyncpa [#allocation9 + $0x1], 0 }
   0xb   :  { %25 = vsyncpa [#allocation12], 0 }
   0xc   :  { %27 = vsyncpa [#allocation12 + $0x1], 0  ;;  %s1415_s30 = smov 0   ;;  %s1417_s10 = smov 0  }
   0xd   :  { %s1419_s11 = smov 0   ;;  %s1421_s12 = smov 0  }
   0xe   :  { %s1423_s13 = smov 0   ;;  %s1425_s14 = smov 0  }
   0xf LB: > { %s1446_s15 = sadd.s32 4294967295, %s1352_s14   ;;  %s1687_s16 = sadd.s32 4294967294, %s1352_s14   ;;  %s1352_s14 = sphi %s1425_s14, %s33_s14   ;;  %s1348_s13 = sphi %s1423_s13, %s1710_s13   ;;  %s1344_s12 = sphi %s1421_s12, %s1709_s12   ;;  %s1340_s11 = sphi %s1419_s11, %s1708_s11   ;;  %s1336_s10 = sphi %s1417_s10, %s1707_s10   ;;  %s1332_s30 = sphi %s1415_s30, %s1706_s30  }
  0x10   : > { %p145_p0 = scmp.ne.s32.totalorder %s1336_s10, %s1332_s30  ;;  %p146_p1 = scmp.eq.s32.totalorder %s1446_s15, 0 }
  0x11   : > { %p220_p2 = scmp.eq.s32.totalorder %s1446_s15, 1  ;;  %p226_p3 = scmp.eq.s32.totalorder %s1687_s16, 1 }
  0x12   : > { %p1457_p4 = por %p146_p1, %p145_p0  ;;  %p991_p5 = scmp.ge.s32.totalorder %s1352_s14, 1 }
  0x13   : > { %p1462_p6 = por %p226_p3, %p145_p0  ;;  %p317_p7 = scmp.lt.s32.totalorder %s1352_s14, 3 }
  0x14   : > { %s1696_s5 = sld [smem:[#allocation22_spill]]  ;;  %s45_s23 = sadd.s32 1, %s1348_s13 }
  0x15   : > { %s1694_s18 = scalar_select %p1462_p6, 1, 0 }
  0x16   : > { %p1470_p8 = pnand %p991_p5, %p317_p7  ;;  %s132_s24 = sadd.s32 1, %s1340_s11 }
  0x17   : > { %1695 = sst [smem:[#allocation18_spill]] %s1694_s18  ;;  %p47_p12 = scmp.ge.s32.totalorder %s45_s23, 2 }
  0x18   : > { %p1032_p10 = pneg %p1470_p8  ;;  %s1354_s25 = smov [#allocation6]  }
  0x19   : > { %s1712_s23 = smov (%p47_p12, %s45_s23), 0  ;;  %p139_p13 = scmp.ne.s32.totalorder %s1340_s11, %s1336_s10 }
  0x1a   : > { %s336_s21 = sshll.u32 %s1696_s5, 4  ;;  %p1033_p11 = pnand %p1032_p10, %p146_p1  ;;  %s337_s21 = int_to_ptr.vmem [resolvable:$true] %s336_s21 }
  0x1b   : > { %1698 = sst [smem:[#allocation19_spill]] %s1712_s23  ;;  %p140_p0 = scmp.eq.s32.totalorder %s1352_s14, 0 }
  0x1c   : > { %1035 = dma.vmem_to_smem (!%p1033_p11), %s337_s21, 16, %s1354_s25, [#allocation5]  }
  0x1d   : > { %s127_s26 = ssub.s32 %s1348_s13, %s1712_s23  ;;  %p1054_p3 = scmp.lt.s32.totalorder %s1352_s14, 2 }
  0x1e   : > { %p130_p5 = scmp.eq.s32.totalorder %s127_s26, 0  ;;  %p141_p7 = por %p140_p0, %p139_p13 }
  0x1f   : > { %p1491_p9 = por %p220_p2, %p139_p13  ;;  %s361_s28 = sand.u32 1, %s1340_s11  }
  0x20   : > { %s1497_s29 = scalar_select %p130_p5, %s1340_s11, %s132_s24  }
  0x21   : > { %s995_s19 = sshll.u32 %s361_s28, 2  ;;  %s996_s20 = sshll.u32 %s1348_s13, 2 }
  0x22   : > { %s370_s16 = scalar_lea.hbm %s1680_s3, %s996_s20  ;;  %s365_s5 = scalar_lea.vmem [#allocation2], %s995_s19 }
  0x23   : > { %s374_s18 = sshll.u32 %s365_s5, 4  ;;  %s372_s23 = sshll.u32 %s370_s16, 4  ;;  %s375_s18 = int_to_ptr.vmem [resolvable:$true] %s374_s18  ;;  %s373_s23 = int_to_ptr.hbm [resolvable:$true] %s372_s23 }
  0x24   : > { %p1037_p10 = pnand %p1054_p3, %p141_p7  ;;  %s362_s26 = scalar_lea.sflag [#allocation3], %s361_s28 }
  0x25   : > { %393 = sbr.rel (%p1470_p8) target bundleno = 379 (0x17b), region = 44  ;;  %s1508_s24 = sand.u32 (!%p1470_p8), 1, %s1336_s10  }
  0x26   : > { %1039 = dma.hbm_to_vmem [thread:$0]  (!%p1037_p10), %s373_s23, 64, %s375_s18, %s362_s26  }
  0x27   : > { %s998_s21 = sshll.u32 (!%p1470_p8), %s1508_s24, 2  ;;  %s396_s20 = scalar_lea.sflag (!%p1470_p8), [#allocation3], %s1508_s24 }
  0x28   : > { %s1512_s19 = scalar_lea.vmem (!%p1470_p8), [#allocation2], %s998_s21 }
  0x2a   : > { %1311 = dma.done.wait (%p1457_p4), %s396_s20, 64  }
  0x2b   : > { %1313 = vsyncadd (%p1457_p4), %s396_s20, 4294967232 }
  0x2c   : > { %1315 = dma.done.wait (%p146_p1), [#allocation5], 16  }
  0x2d   : > { %1317 = vsyncadd (%p146_p1), [#allocation5], 4294967280 }
  0x2e   : > { %410 = sfence }
  0x2f   : > { %p471_p2 = scmp.lt.s32.totalorder %s1344_s12, 1  ;;  %v1355_v0 = vmov 0   ;;  %v1356_v1 = vmov 2   ;;  %v1357_v2 = vmov 4   ;;  %s1700_s0 = sld [smem:[#allocation20_spill]]  ;;  %v1358_v4 = vmov 1  }
  0x30   : > { %1116 = vset.pattern.permute.xlu0 %v1355_v0  ;;  %1118 = vset.pattern.permute.xlu1 %v1356_v1  ;;  %v1359_v5 = vmov 3   ;;  %v1360_v6 = vmov 5   ;;  %v1361_v7 = vmov 6   ;;  %v1362_v8 = vmov 7   ;;  %s1701_s1 = sld [smem:[#allocation21_spill]]  ;;  %s470_s21 = scalar_lea.vmem [#allocation11], %s1508_s24 }
  0x31   : > { %s1524_s5 = scalar_select %p471_p2, %s1344_s12, 1  ;;  %1120 = vset.pattern.permute.xlu2 %v1357_v2  ;;  %vm667_vm0 = vcmask 1041408   ;;  %vm580_vm6 = vcmask 64512  }
  0x32   : > { %s1546_s17 = sld [smem:[#allocation6 + $0x1]] }
  0x33   : > { %s1000_s16 = sshll.u32 %s1524_s5, 3  ;;  %s1002_s23 = sshll.u32 %s1524_s5, 1 }
  0x34   : > { %s489_s26 = scalar_lea.vmem %s1681_s4, %s1002_s23  ;;  %s1009_s18 = sld [smem:[#allocation6 + $0x2]] }
  0x35   : > { %s474_s22 = scalar_lea.vmem %s1700_s0, %s1000_s16  ;;  %v1536_v9 = vld [vmem:[%s489_s26] sm:$0x3]  ;;  %s1010_s23 = sld [smem:[#allocation6 + $0x3]] }
  0x36   : > { %v490_v3 = vld [vmem:[%s474_s22] sm:$0xff]  ;;  %v668_v10 = vsel %vm667_vm0, %v1536_v9, -inf  ;;  %s640_s22 = sld [smem:[#allocation6]]  ;;  %s482_s26 = scalar_lea.vmem %s1679_s2, %s1000_s16 }
  0x37   : > { %494 = vperm.xlu0 %1116, %v490_v3   ;;  %510 = vperm.xlu1 %1118, %v490_v3   ;;  %v669_v11 = vrot.slane %v668_v10, 4  ;;  %v491_v24 = vld [vmem:[%s1701_s1] sm:$0xff]  ;;  %s699_s16 = sand.u32 1, %s1446_s15   ;;  %s1194_s5 = scalar_lea.hbm %s1684_s7, 2 }
  0x38   : > { %526 = vperm.xlu2 %1120, %v490_v3   ;;  %v497_v26 = vperm.slane %v491_v24, 0  ;;  %v513_v29 = vperm.slane %v491_v24, 2  ;;  %v505_v30 = vperm.slane %v491_v24, 1  ;;  %v521_v32 = vperm.slane %v491_v24, 3 }
  0x39   : > { %v670_v12 = vmax.f32 %v668_v10, %v669_v11  ;;  %v529_v37 = vperm.slane %v491_v24, 4  ;;  %v537_v42 = vperm.slane %v491_v24, 5  ;;  %v553_v47 = vperm.slane %v491_v24, 7  ;;  %v1549_v11 = vld [vmem:[%s1512_s19] sm:$0xf]  ;;  %s458_s19 = scalar_lea.vmem [#allocation8], %s1508_s24 }
  0x3a   : > { %v545_v48 = vperm.slane %v491_v24, 6  ;;  %v652_v24 = vstv %s1009_s18  ;;  %s733_s18 = sshll.u32 %s458_s19, 4  ;;  %s734_s18 = int_to_ptr.vmem [resolvable:$true] %s733_s18 }
  0x3b   : > { %v671_v13 = vrot.slane %v670_v12, 2 }
  0x3d   : > { %v672_v14 = vmax.f32 %v670_v12, %v671_v13 }
  0x3f   : > { %1117 = vset.pattern.permute.xlu0 %v1358_v4  ;;  %1119 = vset.pattern.permute.xlu1 %v1359_v5  ;;  %v673_v15 = vrot.slane %v672_v14, 1 }
  0x40   : > { %502 = vperm.xlu0 %1117, %v490_v3   ;;  %518 = vperm.xlu1 %1119, %v490_v3  }
  0x41   : > { %1121 = vset.pattern.permute.xlu2 %v1360_v6  ;;  %v1539_v16 = vmax.f32 %v672_v14, %v673_v15  ;;  %v689_v14 = vrot.slane %v1536_v9, 7 }
  0x42   : > { %534 = vperm.xlu2 %1121, %v490_v3  }
  0x43   : > { %v675_v17 = vsub.f32 %v1536_v9, %v1539_v16 }
  0x45   : > { %v676_v18 = vmul.f32 1.442695, %v675_v17  ;;  %v638_v17 = vand.u32 2147483647, %v1549_v11 }
  0x47   : > { %1125 = vpow2.f32 %v676_v18 }
  0x48   : > { %1122 = vset.pattern.permute.xlu1 %v1361_v7  ;;  %1124 = vset.pattern.permute.xlu0 %v1362_v8  ;;  %v563_v7 = vlaneseq }
  0x49   : > { %542 = vperm.xlu1 %1122, %v490_v3  }
  0x4a   : > { %1123 = vset.pattern.permute.xlu2 %v1362_v8  ;;  %v564_v13 = vshrl.u32 %v563_v7, 7 }
  0x4b   : > { %550 = vperm.xlu2 %1123, %v490_v3  }
  0x4d   : > { %v1126_v19 = vpop.eup %1125 }
  0x4e   : > { %v678_v21 = vsel %vm667_vm0, %v1126_v19, 0.0  ;;  %v645_v19 = vstv %s1546_s17  ;;  %s731_s17 = scalar_lea.hbm %s1684_s7, %s1344_s12 }
  0x4f   : > { %v679_v25 = vrot.slane %v678_v21, 4 }
  0x51   : > { %v680_v28 = vadd.f32 %v679_v25, %v678_v21  ;;  %v1363_v21 = vmov 0.0  }
  0x53   : > { %v681_v35 = vrot.slane %v680_v28, 2 }
  0x55   : > { %v682_v43 = vadd.f32 %v681_v35, %v680_v28  ;;  %v659_v28 = vstv %s1010_s23  ;;  %s1583_s23 = scalar_lea.sflag [#allocation9], %s699_s16 }
  0x57   : > { %v683_v53 = vrot.slane %v682_v43, 1 }
  0x59   : > { %v684_v62 = vadd.f32 %v683_v53, %v682_v43  ;;  %v579_v43 = vld [vmem:[%s482_s26] sm:$0x1f] }
  0x5b   : > { %1127 = vlog2.f32 %v684_v62 }
  0x61   : > { %v1128_v5 = vpop.eup %1127 }
  0x62   : > { %v686_v10 = vmul.f32 0.6931472, %v1128_v5 }
  0x64   : > { %v687_v18 = vadd.f32 %v686_v10, %v1539_v16 }
  0x92   : > { %v527_v20 = vpop.permute.xlu2 %526 }
  0x93   : > { %v530_v45 = vsub.f32 %v527_v20, %v529_v37 }
  0x95   : > { %v531_v54 = vmul.f32 %v530_v45, %v530_v45 }
  0x9c   : > { %v535_v27 = vpop.permute.xlu2 %534 }
  0x9d   : > { %v538_v52 = vsub.f32 %v535_v27, %v537_v42  ;;  %v641_v27 = vstv %s640_s22  ;;  %s735_s22 = sshll.u32 %s731_s17, 4  ;;  %s736_s22 = int_to_ptr.hbm [resolvable:$true] %s735_s22 }
  0x9e   : > { %s1188_s28 = sshra.s32 %s736_s22, 4  ;;  %s1189_s28 = int_to_ptr.hbm [resolvable:$true] %s1188_s28 }
  0x9f   : > { %v539_v60 = vmul.f32 %v538_v52, %v538_v52  ;;  %s1190_s25 = scalar_lea.hbm %s1189_s28, 1  ;;  %p1195_p11 = scmp.lt.s32.totalorder %s1189_s28, %s1684_s7 }
  0xa0   : > { %p1191_p1 = scmp.ne.s32.totalorder %s1189_s28, %s1190_s25  ;;  %p1196_p12 = scmp.lt.s32.totalorder %s1194_s5, %s1190_s25 }
  0xa2   : > { %p1192_p4 = pnand %p1191_p1, %p1491_p9  ;;  %p1197_p13 = por %p1196_p12, %p1195_p11 }
  0xa4   : > { %p1193_p8 = pneg %p1192_p4 }
  0xa5   : > { %v551_v49 = vpop.permute.xlu2 %550 }
  0xa6   : > { %v554_v57 = vsub.f32 %v551_v49, %v553_v47  ;;  %p1198_p0 = pnand %p1197_p13, %p1193_p8 }
  0xa8   : > { %v555_v0 = vmul.f32 %v554_v57, %v554_v57 }
  0xa9   : > { %v495_v22 = vpop.permute.xlu0 %494  ;;  %v511_v23 = vpop.permute.xlu1 %510 }
  0xaa   : > { %v498_v31 = vsub.f32 %v495_v22, %v497_v26  ;;  %v514_v36 = vsub.f32 %v511_v23, %v513_v29 }
  0xac   : > { %v499_v39 = vmul.f32 %v498_v31, %v498_v31  ;;  %v515_v44 = vmul.f32 %v514_v36, %v514_v36 }
  0xb2   : > { %v503_v33 = vpop.permute.xlu0 %502  ;;  %v519_v34 = vpop.permute.xlu1 %518 }
  0xb3   : > { %v506_v38 = vsub.f32 %v503_v33, %v505_v30  ;;  %v522_v41 = vsub.f32 %v519_v34, %v521_v32 }
  0xb5   : > { %v507_v40 = vmul.f32 %v506_v38, %v506_v38  ;;  %v523_v51 = vmul.f32 %v522_v41, %v522_v41 }
  0xb7   : > { %v508_v46 = vadd.f32 %v507_v40, %v499_v39 }
  0xb9   : > { %v516_v50 = vadd.f32 %v515_v44, %v508_v46  ;;  %v1364_v44 = vmov 1.0  }
  0xbb   : > { %v524_v55 = vadd.f32 %v523_v51, %v516_v50  ;;  %v543_v56 = vpop.permute.xlu1 %542 }
  0xbc   : > { %v546_v58 = vsub.f32 %v543_v56, %v545_v48 }
  0xbd   : > { %v532_v59 = vadd.f32 %v531_v54, %v524_v55 }
  0xbe   : > { %v547_v61 = vmul.f32 %v546_v58, %v546_v58 }
  0xbf   : > { %v540_v63 = vadd.f32 %v539_v60, %v532_v59 }
  0xc1   : > { %v548_v1 = vadd.f32 %v547_v61, %v540_v63 }
  0xc3   : > { %v556_v2 = vadd.f32 %v555_v0, %v548_v1 }
  0xc5   : > { %v557_v3 = vrot.slane %v556_v2, 4 }
  0xc7   : > { %v558_v4 = vmin.f32 %v556_v2, %v557_v3 }
  0xc9   : > { %v559_v6 = vrot.slane %v558_v4, 2 }
  0xcb   : > { %v560_v8 = vmin.f32 %v558_v4, %v559_v6 }
  0xcd   : > { %v561_v12 = vrot.slane %v560_v8, 1 }
  0xcf   : > { %v1552_v15 = vmin.f32 %v560_v8, %v561_v12 }
  0xd1   : > { %vm565_vm1 = vcmp.le.f32.partialorder %v556_v2, %v1552_v15  ;;  %vm610_vm2 = vcmp.lt.f32.partialorder %v1552_v15, 4225.0 }
  0xd2   : > { %v566_v20 = vsel %vm565_vm1, %v564_v13, 8  ;;  %v1561_v22 = vsel %vm610_vm2, 1.0, %v1363_v21  ;;  %v691_v23 = vsel %vm610_vm2, %v1536_v9, %v689_v14 }
  0xd3   : > { %v567_v25 = vrot.slane %v566_v20, 4  ;;  %v639_v16 = vmul.f32 %v1561_v22, %v638_v17  ;;  %v692_v26 = vsub.f32 %v687_v18, %v691_v23 }
  0xd5   : > { %vm568_vm3 = vcmp.lt.s32.totalorder %v566_v20, %v567_v25  ;;  %694 = vst [vmem:[%s458_s19 - $0x1] sm:$0x2] %v692_v26  ;;  %v646_v29 = vmul.f32 %v645_v19, %v639_v16  ;;  %v653_v30 = vmul.f32 %v652_v24, %v639_v16  ;;  %v642_v33 = vmul.f32 %v641_v27, %v639_v16 }
  0xd6   : > { %v569_v31 = vsel %vm568_vm3, %v566_v20, %v567_v25  ;;  %v660_v9 = vmul.f32 %v659_v28, %v639_v16 }
  0xd7   : > { %v570_v32 = vrot.slane %v569_v31, 2  ;;  %v648_v34 = vrot.slane %v646_v29, 1  ;;  %v655_v36 = vrot.slane %v653_v30, 2 }
  0xd8   : > { %v662_v40 = vrot.slane %v660_v9, 3 }
  0xd9   : > { %vm571_vm4 = vcmp.lt.s32.totalorder %v569_v31, %v570_v32  ;;  %v650_v35 = vadd.f32 %v648_v34, %v642_v33 }
  0xda   : > { %v572_v37 = vsel %vm571_vm4, %v569_v31, %v570_v32 }
  0xdb   : > { %v573_v38 = vrot.slane %v572_v37, 1  ;;  %v657_v39 = vadd.f32 %v655_v36, %v650_v35 }
  0xdd   : > { %vm574_vm5 = vcmp.lt.s32.totalorder %v572_v37, %v573_v38  ;;  %v664_v41 = vadd.f32 %v662_v40, %v657_v39 }
  0xde   : > { %v575_v42 = vsel %vm574_vm5, %v572_v37, %v573_v38 }
  0xdf   : > { %vm576_vm7 = vcmp.eq.s32.totalorder %v564_v13, %v575_v42  ;;  %665 = vst [vmem:[%s470_s21] sm:$0x1] %v664_v41 }
  0xe0   : > { %1004 = vmatpush.msk.msra.mxu0 %vm576_vm7, %v1364_v44 }
  0xe1   : > { %1005 = vmatmul.msk.f32.vlgmr.msra.gmra.mxu0 %vm580_vm6, %v579_v43 }
  0xe2   : > { %1201 = shalt.err (!%p1198_p0)
}
  0xe3   : > { %1025 = dma.vmem_to_hbm [thread:$0]  (%p1491_p9), %s734_s18, 16, %s736_s22, %s1583_s23  }
  0xe4   : > { %s759_s0 = scalar_lea.hbm %s1686_s9, %s1344_s12  ;;  %s761_s16 = sshll.u32 %s470_s21, 4  ;;  %s762_s16 = int_to_ptr.vmem [resolvable:$true] %s761_s16 }
  0xe5   : > { %s763_s26 = sshll.u32 %s759_s0, 4  ;;  %s708_s28 = scalar_lea.sflag [#allocation12], %s1508_s24  ;;  %s764_s26 = int_to_ptr.hbm [resolvable:$true] %s763_s26 }
  0xe6   : > { %s1216_s25 = sshra.s32 %s764_s26, 4  ;;  %s1222_s18 = scalar_lea.hbm %s1686_s9, 2  ;;  %s1217_s25 = int_to_ptr.hbm [resolvable:$true] %s1216_s25 }
  0xe7   : > { %s1218_s5 = scalar_lea.hbm %s1217_s25, 1  ;;  %p1223_p10 = scmp.lt.s32.totalorder %s1217_s25, %s1686_s9 }
  0xe8   : > { %p1219_p3 = scmp.ne.s32.totalorder %s1217_s25, %s1218_s5  ;;  %p1224_p2 = scmp.lt.s32.totalorder %s1222_s18, %s1218_s5 }
  0xea   : > { %p1220_p5 = pnand %p1219_p3, %p1491_p9  ;;  %p1225_p1 = por %p1224_p2, %p1223_p10 }
  0xec   : > { %p1221_p7 = pneg %p1220_p5 }
  0xee   : > { %p1226_p4 = pnand %p1225_p1, %p1221_p7 }
  0xf0   : > { %1229 = shalt.err (!%p1226_p4)
}
  0xf1   : > { %1027 = dma.vmem_to_hbm [thread:$0]  (%p1491_p9), %s762_s16, 16, %s764_s26, %s708_s28   ;;  %vm628_vm10 = vcmask 1043456  }
  0xf2   : > { %s717_s17 = scalar_lea.hbm %s1683_s6, %s1344_s12  ;;  %s452_s1 = scalar_lea.vmem [#allocation7], %s1508_s24 }
  0xf3   : > { %s1621_s0 = sshll.u32 %s452_s1, 4  ;;  %s721_s16 = sshll.u32 %s717_s17, 4  ;;  %s720_s0 = int_to_ptr.vmem [resolvable:$true] %s1621_s0  ;;  %s722_s16 = int_to_ptr.hbm [resolvable:$true] %s721_s16 }
  0xf4   : > { %s696_s26 = scalar_lea.sflag [#allocation4], %s1508_s24  ;;  %s1244_s28 = sshra.s32 %s722_s16, 4  ;;  %s1245_s28 = int_to_ptr.hbm [resolvable:$true] %s1244_s28 }
  0xf5   : > { %s1246_s25 = scalar_lea.hbm %s1245_s28, 1  ;;  %s1250_s15 = scalar_lea.hbm %s1683_s6, 2 }
  0xf6   : > { %p1247_p8 = scmp.ne.s32.totalorder %s1245_s28, %s1246_s25  ;;  %p1251_p13 = scmp.lt.s32.totalorder %s1245_s28, %s1683_s6 }
  0xf7   : > { %p1252_p0 = scmp.lt.s32.totalorder %s1250_s15, %s1246_s25 }
  0xf8   : > { %p1248_p11 = pnand %p1247_p8, %p1491_p9 }
  0xf9   : > { %p1253_p3 = por %p1252_p0, %p1251_p13 }
  0xfa   : > { %p1249_p12 = pneg %p1248_p11 }
  0xfc   : > { %p1254_p5 = pnand %p1253_p3, %p1249_p12 }
 0x15e   : > { %v601_v45 = vpop.f32.mrf.mxu0 }
 0x15f   : > { %v614_v46 = vadd.f32 0.5, %v601_v45  ;;  %v620_v47 = vsel %vm610_vm2, %v601_v45, 0.0 }
 0x160   : > { %v621_v48 = vsub.f32 %v1549_v11, %v620_v47 }
 0x161   : > { %v615_v49 = vsel %vm610_vm2, %v614_v46, 0.0 }
 0x162   : > { %vm1013_vm8 = vcmp.lt.s32.totalorder %v615_v49, 0  ;;  %v1014_v50 = vceil.f32 %v615_v49  ;;  %v1015_v51 = vfloor.f32 %v615_v49  ;;  %v622_v52 = vand.u32 2147483647, %v621_v48 }
 0x163   : > { %v624_v53 = vmul.f32 0.5, %v621_v48 }
 0x164   : > { %vm623_vm9 = vcmp.lt.f32.partialorder %v622_v52, 1.0  ;;  %v1007_v54 = vadd.f32 -0.5, %v622_v52  ;;  %v1016_v55 = vsel %vm1013_vm8, %v1014_v50, %v1015_v51 }
 0x165   : > { %v625_v56 = vmul.f32 %v624_v53, %v621_v48  ;;  %v1017_v57 = vcvt.f32.s32 %v1016_v55 }
 0x167   : > { %v627_v58 = vsel %vm623_vm9, %v625_v56, %v1007_v54  ;;  %617 = vst [vmem:[%s452_s1 - $0x4] sm:$0x10] %v1017_v57 }
 0x168   : > { %v629_v59 = vsel %vm628_vm10, %v627_v58, 0.0 }
 0x169   : > { %1257 = shalt.err (!%p1254_p5)
}
 0x16a   : > { %1024 = dma.vmem_to_hbm [thread:$0]  (%p1491_p9), %s720_s0, 16, %s722_s16, %s696_s26   ;;  %v630_v60 = vrot.slane %v629_v59, 4 }
 0x16b   : > { %s745_s17 = scalar_lea.hbm %s1685_s8, %s1344_s12  ;;  %s464_s1 = scalar_lea.vmem [#allocation10], %s1508_s24 }
 0x16c   : > { %v631_v61 = vadd.f32 %v630_v60, %v629_v59  ;;  %s747_s28 = sshll.u32 %s464_s1, 4  ;;  %s749_s25 = sshll.u32 %s745_s17, 4  ;;  %s748_s28 = int_to_ptr.vmem [resolvable:$true] %s747_s28  ;;  %s750_s25 = int_to_ptr.hbm [resolvable:$true] %s749_s25 }
 0x16d   : > { %s1272_s0 = sshra.s32 %s750_s25, 4  ;;  %s1278_s12 = scalar_lea.hbm %s1685_s8, 2  ;;  %s1273_s0 = int_to_ptr.hbm [resolvable:$true] %s1272_s0 }
 0x16e   : > { %v632_v62 = vrot.slane %v631_v61, 2  ;;  %s1274_s16 = scalar_lea.hbm %s1273_s0, 1  ;;  %p1279_p1 = scmp.lt.s32.totalorder %s1273_s0, %s1685_s8 }
 0x16f   : > { %p1275_p7 = scmp.ne.s32.totalorder %s1273_s0, %s1274_s16  ;;  %p1280_p4 = scmp.lt.s32.totalorder %s1278_s12, %s1274_s16 }
 0x170   : > { %v633_v63 = vadd.f32 %v632_v62, %v631_v61 }
 0x171   : > { %p1276_p10 = pnand %p1275_p7, %p1491_p9  ;;  %p1281_p8 = por %p1280_p4, %p1279_p1 }
 0x172   : > { %v634_v0 = vrot.slane %v633_v63, 1 }
 0x173   : > { %p1277_p2 = pneg %p1276_p10 }
 0x174   : > { %v635_v1 = vadd.f32 %v634_v0, %v633_v63 }
 0x175   : > { %p1282_p11 = pnand %p1281_p8, %p1277_p2 }
 0x176   : > { %v636_v2 = vmul.f32 %v1561_v22, %v635_v1 }
 0x178   : > { %637 = vst [vmem:[%s464_s1] sm:$0x1] %v636_v2 }
 0x179   : > { %1285 = shalt.err (!%p1282_p11)
}
 0x17a   : > { %1026 = dma.vmem_to_hbm [thread:$0]  (%p1491_p9), %s748_s28, 16, %s750_s25, %s1583_s23  }
 0x17b PF: > { %s775_s18 = sand.u32 1, %s1332_s30   ;;  %p1703_p12 = scmp.ge.s32.totalorder %s1352_s14, 2 }
 0x17c   : > { %s776_s22 = scalar_lea.sflag [#allocation4], %s775_s18 }
 0x17d   : > { %p1041_p13 = pnand %p1703_p12, %p1462_p6 }
 0x17f   : > { %p1042_p0 = pneg %p1041_p13 }
 0x181   : > { %1319 = dma.done.wait (%p1042_p0), %s776_s22, 16  }
 0x182   : > { %1321 = vsyncadd (%p1042_p0), %s776_s22, 4294967280  ;;  %s1704_s21 = sadd.s32 4294967294, %s1352_s14  }
 0x183   : > { %s784_s19 = sand.u32 1, %s1704_s21  }
 0x184   : > { %s785_s17 = scalar_lea.sflag [#allocation9], %s784_s19 }
 0x185   : > { %1323 = dma.done.wait (%p1042_p0), %s785_s17, 32  }
 0x186   : > { %1325 = vsyncadd (%p1042_p0), %s785_s17, 4294967264  ;;  %s803_s27 = scalar_lea.sflag [#allocation12], %s775_s18 }
 0x187   : > { %1327 = dma.done.wait (%p1042_p0), %s803_s27, 16  }
 0x188   : > { %1329 = vsyncadd (%p1042_p0), %s803_s27, 4294967280  ;;  %s33_s14 = sadd.s32 1, %s1352_s14   ;;  %s1705_s23 = sld [smem:[#allocation19_spill]] }
 0x189   : > { %p30_p9 = scmp.ge.s32.totalorder %s33_s14, 4   ;;  %s1706_s30 = smov %s1336_s10 }
 0x18a   : > { %s1707_s10 = smov %s1340_s11  ;;  %s1708_s11 = smov %s1497_s29 }
 0x18b   : > { %s1709_s12 = smov %s1348_s13  ;;  %32 = sbr.rel (!%p30_p9) target bundleno = 15 (0xf), region = 155 }
 0x18e   : > { %s1710_s13 = smov %s1705_s23 }
 0x190   :  { %808 = vsyncpa [#allocation3], 1 }
 0x191   :  { %810 = vsyncpa [#allocation3 + $0x1], 1 }
 0x192   :  { %811 = vsyncpa [#allocation4], 1 }
 0x193   :  { %813 = vsyncpa [#allocation4 + $0x1], 1 }
 0x194   :  { %814 = vsyncpa [#allocation9], 1 }
 0x195   :  { %816 = vsyncpa [#allocation9 + $0x1], 1 }
 0x196   :  { %817 = vsyncpa [#allocation12], 1 }
 0x197   :  { %819 = vsyncpa [#allocation12 + $0x1], 1 }
 0x198   :  { %820 = vsyncpa [#allocation5], 1 }
 0x199   :  { %822 = vsyncpa [#allocation5 + $0x1], 1 }

</bundles_post_ra>
